<compile_context>
chip_gen: v6e
topology: v6e:2x2x1
jax: 0.10.0
libtpu: 0.0.40
codegen_flags: <defaults>
</compile_context>

<pallas_src>
import functools

import jax
import jax.numpy as jnp
from jax.experimental import pallas as pl
from jax.experimental.pallas import tpu as pltpu

LANE = 128
SUBLANE = 8
_TILE_CANDIDATES = (1024, 512, 256, 128)
_LIVE_ACT_BUDGET = 256 * 1024          # ~ vreg file (64 x 4 KiB), all chips


# ----------------------------------------------------------------------------
# helpers
# ----------------------------------------------------------------------------
def _round_up(x, m):
    return (x + m - 1) // m * m


@functools.lru_cache(maxsize=1)
def _tpu_info():
    """(vmem_capacity_bytes, tensorcores_per_chip) with safe fallbacks."""
    vmem_cap = 64 * 1024 * 1024        # conservative default = v7x per-TC VMEM
    n_cores = 1
    try:
        info = pltpu.get_tpu_info()
        cap = int(getattr(info, "vmem_capacity_bytes", 0) or 0)
        if cap > 0:
            vmem_cap = cap
    except Exception:
        pass
    try:
        kind = jax.devices()[0].device_kind.lower()
        if any(tag in kind for tag in ("v7", "v4", "v5p")):
            n_cores = 2                # 2 TensorCores per chip
    except Exception:
        pass
    return vmem_cap, n_cores


def _vmem_limit(nbytes, vmem_cap):
    # generous but generation-safe: never above ~0.7x physical per-core VMEM
    return int(min(max(2 * nbytes, 32 * 1024 * 1024), int(0.7 * vmem_cap)))


def _tile_options(dim_p):
    # dim_p is a multiple of 128 by construction, so 128 always divides it.
    opts = [t for t in _TILE_CANDIDATES if dim_p % t == 0]
    return opts if opts else [dim_p]


def _batch_norm_f32(y, gamma, beta, *, eps, true_b, row_mask):
    """Training-mode BatchNorm1d (biased 1/B batch stats over axis 0), f32 math.

    If row_mask is not None, rows >= true_b are padding and are excluded from
    the statistics (they still flow through row-wise and are sliced away by
    the caller)."""
    if row_mask is None:
        mean = jnp.mean(y, axis=0, keepdims=True)
        cen = y - mean
        var = jnp.mean(cen * cen, axis=0, keepdims=True)
    else:
        inv_b = jnp.float32(1.0 / true_b)
        ym = jnp.where(row_mask, y, 0.0)
        mean = jnp.sum(ym, axis=0, keepdims=True) * inv_b
        cen = y - mean
        cm = jnp.where(row_mask, cen, 0.0)
        var = jnp.sum(cm * cm, axis=0, keepdims=True) * inv_b
    return cen * jax.lax.rsqrt(var + eps) * gamma + beta


# ----------------------------------------------------------------------------
# fused whole-MLP kernel (all layers in one pallas_call, intermediates in VMEM)
# ----------------------------------------------------------------------------
def _fused_mlp_kernel(*refs, n_layers, true_b, eps, use_bn, use_relu,
                      compute_dtype):
    x_ref = refs[0]
    o_ref = refs[-1]
    param_refs = refs[1:-1]

    bp = x_ref.shape[0]
    row_mask = None
    if use_bn and bp != true_b:
        rows = jax.lax.broadcasted_iota(jnp.int32, (bp, 1), 0)
        row_mask = rows < true_b

    h = x_ref[...]
    for layer in range(n_layers):        # static unroll; h stays in VMEM/vregs
        w_ref, b_ref, g_ref, be_ref = param_refs[4 * layer:4 * layer + 4]
        y = jnp.dot(h.astype(compute_dtype), w_ref[...],
                    preferred_element_type=jnp.float32) + b_ref[...]
        if use_bn:
            y = _batch_norm_f32(y, g_ref[...], be_ref[...], eps=eps,
                                true_b=true_b, row_mask=row_mask)
        if use_relu:
            y = jnp.maximum(y, 0.0)
        h = y
    o_ref[...] = h.astype(o_ref.dtype)


def _fused_vmem_bytes(bp, dims_p, mxu_dtype):
    it = jnp.dtype(mxu_dtype).itemsize
    n = bp * dims_p[0] * it                                    # x
    for a, b in zip(dims_p[:-1], dims_p[1:]):
        n += a * b * it + 3 * b * 4                            # w + b/gamma/beta
    n += bp * dims_p[-1] * 4                                   # output
    n += 2 * bp * max(dims_p) * 4                              # live activations
    return n


def _fused_cost(bp, dims_p, mxu_dtype):
    it = jnp.dtype(mxu_dtype).itemsize
    flops = sum(2 * bp * a * b for a, b in zip(dims_p[:-1], dims_p[1:]))
    byt = bp * dims_p[0] * it + bp * dims_p[-1] * 4
    byt += sum(a * b * it + 3 * b * 4 for a, b in zip(dims_p[:-1], dims_p[1:]))
    return pl.CostEstimate(flops=int(flops), transcendentals=0,
                           bytes_accessed=int(byt))


def _mlp_forward_fused(x_p, prepared, *, true_b, use_bn, use_relu, eps):
    vmem_cap, _ = _tpu_info()
    bp, d0p = x_p.shape
    mxu_dtype = prepared[0]["w"].dtype
    dims_p = [d0p] + [p["w"].shape[1] for p in prepared]
    n_layers = len(prepared)

    args = [x_p]
    in_specs = [pl.BlockSpec((bp, d0p), lambda: (0, 0))]
    for p in prepared:
        din_p, dout_p = p["w"].shape
        args += [p["w"], p["b"], p["gamma"], p["beta"]]
        in_specs += [
            pl.BlockSpec((din_p, dout_p), lambda: (0, 0)),
            pl.BlockSpec((1, dout_p), lambda: (0, 0)),
            pl.BlockSpec((1, dout_p), lambda: (0, 0)),
            pl.BlockSpec((1, dout_p), lambda: (0, 0)),
        ]

    kernel = functools.partial(
        _fused_mlp_kernel, n_layers=n_layers, true_b=true_b, eps=eps,
        use_bn=use_bn, use_relu=use_relu, compute_dtype=mxu_dtype)
    nbytes = _fused_vmem_bytes(bp, dims_p, mxu_dtype)
    return pl.pallas_call(
        kernel,
        out_shape=jax.ShapeDtypeStruct((bp, dims_p[-1]), jnp.float32),
        in_specs=in_specs,
        out_specs=pl.BlockSpec((bp, dims_p[-1]), lambda: (0, 0)),
        compiler_params=pltpu.CompilerParams(
            vmem_limit_bytes=_vmem_limit(nbytes, vmem_cap)),
        cost_estimate=_fused_cost(bp, dims_p, mxu_dtype),
    )(*args)


# ----------------------------------------------------------------------------
# tiled per-layer kernel (grid over Dout "parallel" x Din "arbitrary")
# ----------------------------------------------------------------------------
def _tiled_layer_kernel(x_ref, w_ref, b_ref, g_ref, be_ref, o_ref, acc_ref, *,
                        eps, use_bn, use_relu, true_b, tk, x_resident):
    k = pl.program_id(1)

    @pl.when(k == 0)
    def _():
        acc_ref[...] = jnp.zeros_like(acc_ref)

    if x_resident:
        # x is the full (bp, din_p) block, resident in VMEM for the whole grid;
        # slice the current K chunk (start is statically a multiple of tk).
        xs = x_ref[:, pl.ds(pl.multiple_of(k * tk, tk), tk)]
    else:
        xs = x_ref[...]
    acc_ref[...] += jnp.dot(xs, w_ref[...], preferred_element_type=jnp.float32)

    @pl.when(k == pl.num_programs(1) - 1)
    def _():
        y = acc_ref[...] + b_ref[...]
        bp = y.shape[0]
        row_mask = None
        if use_bn and bp != true_b:
            rows = jax.lax.broadcasted_iota(jnp.int32, (bp, 1), 0)
            row_mask = rows < true_b
        if use_bn:
            # full batch is inside every block, so per-feature batch statistics
            # are exact even though Dout is tiled.
            y = _batch_norm_f32(y, g_ref[...], be_ref[...], eps=eps,
                                true_b=true_b, row_mask=row_mask)
        if use_relu:
            y = jnp.maximum(y, 0.0)
        o_ref[...] = y.astype(o_ref.dtype)


def _tiled_layer_call(x, w, b, gamma, beta, *, true_b, out_dtype, use_bn,
                      use_relu, eps):
    vmem_cap, n_cores = _tpu_info()
    budget = int(0.7 * vmem_cap)

    bp, din_p = x.shape
    dout_p = w.shape[1]
    xit = x.dtype.itemsize
    wit = w.dtype.itemsize
    oit = jnp.dtype(out_dtype).itemsize

    tn_opts = _tile_options(dout_p)
    tk_opts = _tile_options(din_p)
    tn_i, tk_i = 0, 0

    # Keep the whole x resident in VMEM when it comfortably fits; otherwise
    # fall back to streaming (bp, tk) blocks per grid step.
    x_resident = bp * din_p * xit <= budget // 2

    def working_set(tn_, tk_, resident, wbufs):
        n = wbufs * tk_ * tn_ * wit + 2 * 3 * tn_ * 4   # W stream + b/gamma/beta
        n += bp * tn_ * 4                                # f32 accumulator
        n += 2 * bp * tn_ * oit                          # double-buffered output
        n += (bp * din_p * xit) if resident else (2 * bp * tk_ * xit)
        return n

    # On 2-TC chips prefer >=2 parallel N tiles so the "parallel" axis can be
    # sharded across both TensorCores.
    if n_cores >= 2:
        while dout_p // tn_opts[tn_i] < n_cores and tn_i + 1 < len(tn_opts):
            tn_i += 1
    # Shrink tn first (never bp: BN needs the full batch per block), then tk,
    # so the working set stays under the generation-aware VMEM budget.
    while (working_set(tn_opts[tn_i], tk_opts[tk_i], x_resident, 2) > budget
           and tn_i + 1 < len(tn_opts)):
        tn_i += 1
    while (working_set(tn_opts[tn_i], tk_opts[tk_i], x_resident, 2) > budget
           and tk_i + 1 < len(tk_opts)):
        tk_i += 1
    if working_set(tn_opts[tn_i], tk_opts[tk_i], x_resident, 2) > budget:
        x_resident = False
    tn, tk = tn_opts[tn_i], tk_opts[tk_i]

    grid = (dout_p // tn, din_p // tk)   # (N parallel, K arbitrary/reduction)
    kernel = functools.partial(_tiled_layer_kernel, eps=eps, use_bn=use_bn,
                               use_relu=use_relu, true_b=true_b, tk=tk,
                               x_resident=x_resident)
    x_bytes = bp * din_p * xit if x_resident else bp * din_p * xit * grid[0]
    cost = pl.CostEstimate(
        flops=int(2 * bp * din_p * dout_p), transcendentals=0,
        bytes_accessed=int(x_bytes + din_p * dout_p * wit + 3 * dout_p * 4
                           + bp * dout_p * oit))

    if x_resident:
        x_spec = pl.BlockSpec((bp, din_p), lambda n, k: (0, 0))
    else:
        x_spec = pl.BlockSpec((bp, tk), lambda n, k: (0, k))
    small = lambda: pl.BlockSpec((1, tn), lambda n, k: (0, n))

    def _call(wbufs):
        if wbufs > 2:
            w_spec = pl.BlockSpec((tk, tn), lambda n, k: (k, n),
                                  pipeline_mode=pl.Buffered(wbufs))
        else:
            w_spec = pl.BlockSpec((tk, tn), lambda n, k: (k, n))
        nbytes = working_set(tn, tk, x_resident, wbufs)
        return pl.pallas_call(
            kernel,
            out_shape=jax.ShapeDtypeStruct((bp, dout_p), out_dtype),
            grid=grid,
            in_specs=[x_spec, w_spec, small(), small(), small()],
            out_specs=pl.BlockSpec((bp, tn), lambda n, k: (0, n)),
            scratch_shapes=[pltpu.VMEM((bp, tn), jnp.float32)],
            compiler_params=pltpu.CompilerParams(
                dimension_semantics=("parallel", "arbitrary"),
                vmem_limit_bytes=_vmem_limit(nbytes, vmem_cap)),
            cost_estimate=cost,
        )(x, w, b, gamma, beta)

    # 3-deep W-stream buffering helps DMA-latency-bound small-batch layers
    # (mainly v5e); fall back to default double buffering if unsupported.
    want_buffered = (grid[0] * grid[1] >= 3
                     and working_set(tn, tk, x_resident, 3) <= budget)
    if want_buffered:
        try:
            return _call(3)
        except Exception:
            pass
    return _call(2)


# ----------------------------------------------------------------------------
# parameter init / preparation and forward wrapper
# ----------------------------------------------------------------------------
def init_mlp_params(key, shapes):
    """Deterministic params matching nn.Linear / nn.BatchNorm1d shapes."""
    params = []
    for idx in range(len(shapes) - 1):
        din, dout = shapes[idx], shapes[idx + 1]
        key, kw, kb = jax.random.split(key, 3)
        bound = 1.0 / jnp.sqrt(jnp.float32(din))
        # PyTorch Linear weight is (dout, din); store pre-transposed (din, dout).
        w = jax.random.uniform(kw, (din, dout), jnp.float32, -bound, bound)
        b = jax.random.uniform(kb, (1, dout), jnp.float32, -bound, bound)
        gamma = jnp.ones((1, dout), jnp.float32)   # BatchNorm1d weight
        beta = jnp.zeros((1, dout), jnp.float32)   # BatchNorm1d bias
        params.append((w, b, gamma, beta))
    return params


def prepare_mlp_params(params, mxu_dtype=jnp.bfloat16):
    """Pad feature dims to 128 (lane-dense) and cast weights to the MXU dtype."""
    prepared = []
    for (w, b, gamma, beta) in params:
        din, dout = w.shape
        din_p, dout_p = _round_up(din, LANE), _round_up(dout, LANE)
        w_p = jnp.pad(w, ((0, din_p - din), (0, dout_p - dout))).astype(mxu_dtype)
        b_p = jnp.pad(b.reshape(1, -1),
                      ((0, 0), (0, dout_p - dout))).astype(jnp.float32)
        g_p = jnp.pad(gamma.reshape(1, -1), ((0, 0), (0, dout_p - dout)),
                      constant_values=1.0).astype(jnp.float32)
        be_p = jnp.pad(beta.reshape(1, -1),
                       ((0, 0), (0, dout_p - dout))).astype(jnp.float32)
        prepared.append(dict(w=w_p, b=b_p, gamma=g_p, beta=be_p,
                             din=din, dout=dout))
    return prepared


def mlp_forward(x, prepared, *, bn=True, activation="relu", eps=1e-5,
                force_path=None):
    """Forward pass matching the PyTorch MLP (training-mode BatchNorm1d)."""
    use_relu = activation == "relu"
    mxu_dtype = prepared[0]["w"].dtype
    vmem_cap, n_cores = _tpu_info()
    B, din = x.shape
    assert din == prepared[0]["din"], "input width mismatch"

    # bf16 packs 2 rows/sublane (16 rows per vreg): pad B so activation vregs
    # are fully packed. (f32 -> 8, int8/fp8 -> 32.)
    sub = max(SUBLANE, 32 // max(1, jnp.dtype(mxu_dtype).itemsize))
    bp = _round_up(B, sub)
    d0p = prepared[0]["w"].shape[0]
    dims_p = [d0p] + [p["w"].shape[1] for p in prepared]
    x_p = jnp.pad(x, ((0, bp - B), (0, d0p - din))).astype(mxu_dtype)

    if force_path == "fused":
        use_fused = True
    elif force_path == "tiled":
        use_fused = False
    else:
        fused_budget = int(0.5 * vmem_cap)
        live_act = bp * max(dims_p) * 4            # largest f32 live activation
        trivial = max(dims_p) <= 256 and bp <= 512
        use_fused = (_fused_vmem_bytes(bp, dims_p, mxu_dtype) <= fused_budget
                     and live_act <= _LIVE_ACT_BUDGET
                     and (n_cores == 1 or trivial))   # gridless = single TC

    if use_fused:
        out_p = _mlp_forward_fused(x_p, prepared, true_b=B, use_bn=bn,
                                   use_relu=use_relu, eps=eps)
    else:
        h = x_p
        for i, p in enumerate(prepared):
            last = i == len(prepared) - 1
            h = _tiled_layer_call(
                h, p["w"], p["b"], p["gamma"], p["beta"], true_b=B,
                out_dtype=jnp.float32 if last else mxu_dtype,
                use_bn=bn, use_relu=use_relu, eps=eps)
        out_p = h

    return out_p[:B, :prepared[-1]["dout"]]


def mlp_reference(x, params, *, bn=True, activation="relu", eps=1e-5,
                  matmul_dtype=jnp.float32):
    """Pure-JAX reference (training-mode BN). matmul_dtype=bf16 matches the
    kernel's MXU rounding; f32 gives the exact PyTorch-f32 semantics."""
    h = x
    for (w, b, gamma, beta) in params:
        y = jnp.dot(h.astype(matmul_dtype), w.astype(matmul_dtype),
                    preferred_element_type=jnp.float32) + b
        if bn:
            mean = jnp.mean(y, axis=0, keepdims=True)
            var = jnp.mean((y - mean) ** 2, axis=0, keepdims=True)
            y = (y - mean) * jax.lax.rsqrt(var + eps) * gamma + beta
        if activation == "relu":
            y = jnp.maximum(y, 0.0)
        h = y
    return h


if __name__ == "__main__":
    key = jax.random.PRNGKey(0)

    # ---- test 1: small MLP, fully fused single-kernel path ------------------
    shapes = [32, 64, 16]     # MLP(shapes=[32, 64, 16], activation='relu', bn=True)
    batch = 8
    key, kx, kp = jax.random.split(key, 3)
    x = jax.random.normal(kx, (batch, shapes[0]), jnp.float32)
    params = init_mlp_params(kp, shapes)
    prepared = prepare_mlp_params(params, mxu_dtype=jnp.bfloat16)

    out = mlp_forward(x, prepared, bn=True, activation="relu")
    out = jax.block_until_ready(out)
    assert out.shape == (batch, shapes[-1])

    ref_matched = mlp_reference(x, params, matmul_dtype=jnp.bfloat16)
    ref_f32 = mlp_reference(x, params, matmul_dtype=jnp.float32)
    assert jnp.allclose(out, ref_matched, atol=1e-2, rtol=1e-2), \
        "fused kernel mismatch vs bf16-matched reference"
    assert float(jnp.max(jnp.abs(out - ref_f32))) < 0.1, \
        "fused kernel drifted too far from f32 reference"

    # ---- test 2: tiled grid path (resident x, padded batch rows, masking) ---
    shapes2 = [256, 512, 128]
    batch2 = 12               # not a multiple of 16 -> exercises BN row masking
    key, kx2, kp2 = jax.random.split(key, 3)
    x2 = jax.random.normal(kx2, (batch2, shapes2[0]), jnp.float32)
    params2 = init_mlp_params(kp2, shapes2)
    prepared2 = prepare_mlp_params(params2, mxu_dtype=jnp.bfloat16)

    out2 = mlp_forward(x2, prepared2, bn=True, activation="relu",
                       force_path="tiled")
    out2 = jax.block_until_ready(out2)
    assert out2.shape == (batch2, shapes2[-1])
    ref2 = mlp_reference(x2, params2, matmul_dtype=jnp.bfloat16)
    assert jnp.allclose(out2, ref2, atol=1e-2, rtol=1e-2), \
        "tiled kernel mismatch vs bf16-matched reference"

    print("KERNEL_OK")
</pallas_src>

<mosaic_0001>
module attributes {stable_mosaic.version = 11 : i64} {
  func.func @_fused_mlp_kernel(%arg0: memref<16x128xbf16, #tpu.memory_space<vmem>>, %arg1: memref<128x128xbf16, #tpu.memory_space<vmem>>, %arg2: memref<1x128xf32, #tpu.memory_space<vmem>>, %arg3: memref<1x128xf32, #tpu.memory_space<vmem>>, %arg4: memref<1x128xf32, #tpu.memory_space<vmem>>, %arg5: memref<128x128xbf16, #tpu.memory_space<vmem>>, %arg6: memref<1x128xf32, #tpu.memory_space<vmem>>, %arg7: memref<1x128xf32, #tpu.memory_space<vmem>>, %arg8: memref<1x128xf32, #tpu.memory_space<vmem>>, %arg9: memref<16x128xf32, #tpu.memory_space<vmem>>) attributes {dimension_semantics = [], scalar_prefetch = 0 : i64, scratch_operands = 0 : i64, tpu.core_type = #tpu.core_type<tc>} {
    %0 = tpu.iota {dimensions = array<i32: 0>} : vector<16x1xi32>
    %c8_i32 = arith.constant 8 : i32
    %1 = vector.broadcast %c8_i32 : i32 to vector<16x1xi32>
    %2 = arith.cmpi slt, %0, %1 : vector<16x1xi32>
    %c0 = arith.constant 0 : index
    %c0_0 = arith.constant 0 : index
    %3 = vector.load %arg0[%c0, %c0_0] : memref<16x128xbf16, #tpu.memory_space<vmem>>, vector<16x128xbf16>
    %c0_1 = arith.constant 0 : index
    %c0_2 = arith.constant 0 : index
    %4 = vector.load %arg1[%c0_1, %c0_2] : memref<128x128xbf16, #tpu.memory_space<vmem>>, vector<128x128xbf16>
    %cst = arith.constant dense<0.000000e+00> : vector<16x128xf32>
    %5 = tpu.matmul %3, %4, %cst {dimension_numbers = #tpu.dot_dimension_numbers<[1], [0], [0], [1], [0, 0, 1, 1], [], []>} : vector<16x128xbf16>, vector<128x128xbf16>, vector<16x128xf32> -> vector<16x128xf32>
    %c0_3 = arith.constant 0 : index
    %c0_4 = arith.constant 0 : index
    %6 = vector.load %arg2[%c0_3, %c0_4] : memref<1x128xf32, #tpu.memory_space<vmem>>, vector<1x128xf32>
    %7 = vector.broadcast %6 : vector<1x128xf32> to vector<16x128xf32>
    %8 = arith.addf %5, %7 : vector<16x128xf32>
    %c0_5 = arith.constant 0 : index
    %c0_6 = arith.constant 0 : index
    %9 = vector.load %arg3[%c0_5, %c0_6] : memref<1x128xf32, #tpu.memory_space<vmem>>, vector<1x128xf32>
    %c0_7 = arith.constant 0 : index
    %c0_8 = arith.constant 0 : index
    %10 = vector.load %arg4[%c0_7, %c0_8] : memref<1x128xf32, #tpu.memory_space<vmem>>, vector<1x128xf32>
    %cst_9 = arith.constant 0.000000e+00 : f32
    %11 = vector.shape_cast %2 : vector<16x1xi1> to vector<16x1xi1>
    %12 = vector.broadcast %11 : vector<16x1xi1> to vector<16x128xi1>
    %13 = vector.broadcast %cst_9 : f32 to vector<16x128xf32>
    %14 = arith.select %12, %8, %13 : vector<16x128xi1>, vector<16x128xf32>
    %cst_10 = arith.constant dense<0.000000e+00> : vector<128xf32>
    %15 = vector.multi_reduction <add>, %14, %cst_10 [0] : vector<16x128xf32> to vector<128xf32>
    %16 = vector.shape_cast %15 : vector<128xf32> to vector<1x128xf32>
    %cst_11 = arith.constant 1.250000e-01 : f32
    %17 = vector.broadcast %cst_11 : f32 to vector<1x128xf32>
    %18 = arith.mulf %16, %17 : vector<1x128xf32>
    %19 = vector.broadcast %18 : vector<1x128xf32> to vector<16x128xf32>
    %20 = arith.subf %8, %19 : vector<16x128xf32>
    %cst_12 = arith.constant 0.000000e+00 : f32
    %21 = vector.shape_cast %2 : vector<16x1xi1> to vector<16x1xi1>
    %22 = vector.broadcast %21 : vector<16x1xi1> to vector<16x128xi1>
    %23 = vector.broadcast %cst_12 : f32 to vector<16x128xf32>
    %24 = arith.select %22, %20, %23 : vector<16x128xi1>, vector<16x128xf32>
    %25 = arith.mulf %24, %24 : vector<16x128xf32>
    %cst_13 = arith.constant dense<0.000000e+00> : vector<128xf32>
    %26 = vector.multi_reduction <add>, %25, %cst_13 [0] : vector<16x128xf32> to vector<128xf32>
    %27 = vector.shape_cast %26 : vector<128xf32> to vector<1x128xf32>
    %cst_14 = arith.constant 1.250000e-01 : f32
    %28 = vector.broadcast %cst_14 : f32 to vector<1x128xf32>
    %29 = arith.mulf %27, %28 : vector<1x128xf32>
    %cst_15 = arith.constant 9.99999974E-6 : f32
    %30 = vector.broadcast %cst_15 : f32 to vector<1x128xf32>
    %31 = arith.addf %29, %30 : vector<1x128xf32>
    %32 = math.rsqrt %31 : vector<1x128xf32>
    %33 = vector.broadcast %32 : vector<1x128xf32> to vector<16x128xf32>
    %34 = arith.mulf %20, %33 : vector<16x128xf32>
    %35 = vector.broadcast %9 : vector<1x128xf32> to vector<16x128xf32>
    %36 = arith.mulf %34, %35 : vector<16x128xf32>
    %37 = vector.broadcast %10 : vector<1x128xf32> to vector<16x128xf32>
    %38 = arith.addf %36, %37 : vector<16x128xf32>
    %cst_16 = arith.constant 0.000000e+00 : f32
    %39 = vector.broadcast %cst_16 : f32 to vector<16x128xf32>
    %40 = arith.maximumf %38, %39 : vector<16x128xf32>
    %41 = arith.truncf %40 : vector<16x128xf32> to vector<16x128xbf16>
    %c0_17 = arith.constant 0 : index
    %c0_18 = arith.constant 0 : index
    %42 = vector.load %arg5[%c0_17, %c0_18] : memref<128x128xbf16, #tpu.memory_space<vmem>>, vector<128x128xbf16>
    %cst_19 = arith.constant dense<0.000000e+00> : vector<16x128xf32>
    %43 = tpu.matmul %41, %42, %cst_19 {dimension_numbers = #tpu.dot_dimension_numbers<[1], [0], [0], [1], [0, 0, 1, 1], [], []>} : vector<16x128xbf16>, vector<128x128xbf16>, vector<16x128xf32> -> vector<16x128xf32>
    %c0_20 = arith.constant 0 : index
    %c0_21 = arith.constant 0 : index
    %44 = vector.load %arg6[%c0_20, %c0_21] : memref<1x128xf32, #tpu.memory_space<vmem>>, vector<1x128xf32>
    %45 = vector.broadcast %44 : vector<1x128xf32> to vector<16x128xf32>
    %46 = arith.addf %43, %45 : vector<16x128xf32>
    %c0_22 = arith.constant 0 : index
    %c0_23 = arith.constant 0 : index
    %47 = vector.load %arg7[%c0_22, %c0_23] : memref<1x128xf32, #tpu.memory_space<vmem>>, vector<1x128xf32>
    %c0_24 = arith.constant 0 : index
    %c0_25 = arith.constant 0 : index
    %48 = vector.load %arg8[%c0_24, %c0_25] : memref<1x128xf32, #tpu.memory_space<vmem>>, vector<1x128xf32>
    %cst_26 = arith.constant 0.000000e+00 : f32
    %49 = vector.shape_cast %2 : vector<16x1xi1> to vector<16x1xi1>
    %50 = vector.broadcast %49 : vector<16x1xi1> to vector<16x128xi1>
    %51 = vector.broadcast %cst_26 : f32 to vector<16x128xf32>
    %52 = arith.select %50, %46, %51 : vector<16x128xi1>, vector<16x128xf32>
    %cst_27 = arith.constant dense<0.000000e+00> : vector<128xf32>
    %53 = vector.multi_reduction <add>, %52, %cst_27 [0] : vector<16x128xf32> to vector<128xf32>
    %54 = vector.shape_cast %53 : vector<128xf32> to vector<1x128xf32>
    %cst_28 = arith.constant 1.250000e-01 : f32
    %55 = vector.broadcast %cst_28 : f32 to vector<1x128xf32>
    %56 = arith.mulf %54, %55 : vector<1x128xf32>
    %57 = vector.broadcast %56 : vector<1x128xf32> to vector<16x128xf32>
    %58 = arith.subf %46, %57 : vector<16x128xf32>
    %cst_29 = arith.constant 0.000000e+00 : f32
    %59 = vector.shape_cast %2 : vector<16x1xi1> to vector<16x1xi1>
    %60 = vector.broadcast %59 : vector<16x1xi1> to vector<16x128xi1>
    %61 = vector.broadcast %cst_29 : f32 to vector<16x128xf32>
    %62 = arith.select %60, %58, %61 : vector<16x128xi1>, vector<16x128xf32>
    %63 = arith.mulf %62, %62 : vector<16x128xf32>
    %cst_30 = arith.constant dense<0.000000e+00> : vector<128xf32>
    %64 = vector.multi_reduction <add>, %63, %cst_30 [0] : vector<16x128xf32> to vector<128xf32>
    %65 = vector.shape_cast %64 : vector<128xf32> to vector<1x128xf32>
    %cst_31 = arith.constant 1.250000e-01 : f32
    %66 = vector.broadcast %cst_31 : f32 to vector<1x128xf32>
    %67 = arith.mulf %65, %66 : vector<1x128xf32>
    %cst_32 = arith.constant 9.99999974E-6 : f32
    %68 = vector.broadcast %cst_32 : f32 to vector<1x128xf32>
    %69 = arith.addf %67, %68 : vector<1x128xf32>
    %70 = math.rsqrt %69 : vector<1x128xf32>
    %71 = vector.broadcast %70 : vector<1x128xf32> to vector<16x128xf32>
    %72 = arith.mulf %58, %71 : vector<16x128xf32>
    %73 = vector.broadcast %47 : vector<1x128xf32> to vector<16x128xf32>
    %74 = arith.mulf %72, %73 : vector<16x128xf32>
    %75 = vector.broadcast %48 : vector<1x128xf32> to vector<16x128xf32>
    %76 = arith.addf %74, %75 : vector<16x128xf32>
    %cst_33 = arith.constant 0.000000e+00 : f32
    %77 = vector.broadcast %cst_33 : f32 to vector<16x128xf32>
    %78 = arith.maximumf %76, %77 : vector<16x128xf32>
    %c0_34 = arith.constant 0 : index
    %c0_35 = arith.constant 0 : index
    %79 = vector.load %arg9[%c0_34, %c0_35] : memref<16x128xf32, #tpu.memory_space<vmem>>, vector<16x128xf32>
    tpu.vector_store %arg9[%c0_34, %c0_35], %78 {strides = array<i32>} : memref<16x128xf32, #tpu.memory_space<vmem>>, vector<16x128xf32>,
    return
  }
}

</mosaic_0001>

<bundles_post_ra>
// kernel: tpu_custom_call.1
= control target key start
LH: loop header
LB: loop body
LE: loop exit
PB: predicated region body
PF: predicated region fallthrough
CT: control target
= control target key end

     0   :  { %14 = vsyncpa [#allocation3], 0  ;;  %s721_s0 = inlined_call_operand.hbm [shape: bf16[16,128], index: 0, kind: input, shape index: {}]   ;;  %s722_s1 = inlined_call_operand.hbm [shape: bf16[128,128], index: 1, kind: input, shape index: {}]   ;;  %s723_s2 = inlined_call_operand.vmem [shape: f32[1,128], index: 2, kind: input, shape index: {}]   ;;  %s724_s3 = inlined_call_operand.vmem [shape: f32[1,128], index: 3, kind: input, shape index: {}]   ;;  %s725_s4 = inlined_call_operand.vmem [shape: f32[1,128], index: 4, kind: input, shape index: {}]   ;;  %s726_s5 = inlined_call_operand.hbm [shape: bf16[128,128], index: 5, kind: input, shape index: {}]   ;;  %s727_s6 = inlined_call_operand.vmem [shape: f32[1,128], index: 6, kind: input, shape index: {}]   ;;  %s728_s7 = inlined_call_operand.vmem [shape: f32[1,128], index: 7, kind: input, shape index: {}]   ;;  %s729_s8 = inlined_call_operand.vmem [shape: f32[1,128], index: 8, kind: input, shape index: {}]   ;;  %s730_s9 = inlined_call_operand.hbm [shape: f32[16,128], index: 9, kind: output, shape index: {}]  }
   0x1   :  { %15 = vsyncpa [#allocation6], 0 }
   0x2   :  { %16 = vsyncpa [#allocation4], 0  ;;  %s631_s30 = smov [#allocation5]   ;;  %s632_s11 = smov [#allocation2]  }
   0x3   :  { %s34_s10 = sshll.u32 %s631_s30, 4  ;;  %s22_s12 = sshll.u32 %s632_s11, 4  ;;  %s35_s10 = int_to_ptr.vmem [resolvable:$true] %s34_s10  ;;  %s23_s12 = int_to_ptr.vmem [resolvable:$true] %s22_s12 }
   0x4   :  { %s553_s13 = scalar_lea.vmem %s35_s10, 1024  ;;  %p558_p1 = scmp.lt.s32.totalorder %s35_s10, %s35_s10 }
   0x5   :  { %p554_p0 = scmp.ne.s32.totalorder %s35_s10, %s553_s13  ;;  %p559_p2 = scmp.lt.s32.totalorder %s553_s13, %s553_s13 }
   0x7   :  { %p560_p3 = por %p559_p2, %p558_p1 }
   0x9   :  { %p561_p4 = pnand %p560_p3, %p554_p0 }
   0xb   :  { %564 = shalt.err (!%p561_p4)
}
   0xc   :  { %s633_s14 = smov 64   ;;  %s634_s15 = smov 4  }
   0xd   :  { %40 = dma.hbm_to_vmem [thread:$0]  %s722_s1, 1024, %s35_s10, [#allocation6], %s633_s14, %s633_s14, %s634_s15  }
   0xe   :  { %s573_s18 = scalar_lea.vmem %s23_s12, 128  ;;  %p578_p6 = scmp.lt.s32.totalorder %s23_s12, %s23_s12 }
   0xf   :  { %p574_p5 = scmp.ne.s32.totalorder %s23_s12, %s573_s18  ;;  %p579_p7 = scmp.lt.s32.totalorder %s573_s18, %s573_s18 }
  0x11   :  { %p580_p8 = por %p579_p7, %p578_p6 }
  0x13   :  { %p581_p9 = pnand %p580_p8, %p574_p5 }
  0x15   :  { %584 = shalt.err (!%p581_p9)
}
  0x16   :  { %28 = dma.hbm_to_vmem [thread:$0]  %s721_s0, 128, %s23_s12, [#allocation3], %s633_s14, %s633_s14, %s634_s15  }
  0x17   :  { %s635_s21 = smov [#allocation7]  }
  0x18   :  { %s52_s22 = sshll.u32 %s635_s21, 4  ;;  %s53_s22 = int_to_ptr.vmem [resolvable:$true] %s52_s22 }
  0x19   :  { %s593_s23 = scalar_lea.vmem %s53_s22, 1024  ;;  %p598_p11 = scmp.lt.s32.totalorder %s53_s22, %s53_s22 }
  0x1a   :  { %p594_p10 = scmp.ne.s32.totalorder %s53_s22, %s593_s23  ;;  %p599_p12 = scmp.lt.s32.totalorder %s593_s23, %s593_s23 }
  0x1c   :  { %p600_p13 = por %p599_p12, %p598_p11 }
  0x1e   :  { %p601_p0 = pnand %p600_p13, %p594_p10 }
  0x20   :  { %604 = shalt.err (!%p601_p0)
}
  0x21   :  { %58 = dma.hbm_to_vmem [thread:$0]  %s726_s5, 1024, %s53_s22, [#allocation6], %s633_s14, %s633_s14, %s634_s15  }
  0x22   :  { %625 = dma.done.wait [#allocation3], 128  }
  0x23   :  { %626 = vsyncadd [#allocation3], 4294967168 }
  0x24   :  { %627 = dma.done.wait [#allocation6], 2048  }
  0x25   :  { %628 = vsyncadd [#allocation6], 4294965248  ;;  %v636_v0 = vmov 0.0   ;;  %vm637_vm0 = vmmov 0   ;;  %v524_v1 = vld [vmem:[#allocation5 + $0x38] sm:$0xff]   ;;  %v525_v2 = vld [vmem:[#allocation5 + $0x30] sm:$0xff]  }
  0x26   :  { %474 = vmatprep.subr.bf16.mxu0 %v636_v0  ;;  %490 = vmatprep.mubr.msk.bf16.mxu0 %vm637_vm0, %v636_v0  ;;  %v526_v3 = vld [vmem:[#allocation5 + $0x28] sm:$0xff]   ;;  %v527_v4 = vld [vmem:[#allocation5 + $0x20] sm:$0xff]   ;;  %v528_v5 = vld [vmem:[#allocation5 + $0x18] sm:$0xff]   ;;  %s638_s10 = smov [#allocation8]  }
  0x27   :  { %494 = vmatprep.subr.bf16.mxu1 %v636_v0  ;;  %510 = vmatprep.mubr.msk.bf16.mxu1 %vm637_vm0, %v636_v0  ;;  %v529_v6 = vld [vmem:[#allocation5 + $0x10] sm:$0xff]   ;;  %v530_v7 = vld [vmem:[#allocation5 + $0x8] sm:$0xff]   ;;  %v531_v8 = vld [vmem:[#allocation5] sm:$0xff]   ;;  %s420_s11 = sshll.u32 %s638_s10, 4  ;;  %s421_s11 = int_to_ptr.vmem [resolvable:$true] %s420_s11 }
  0x28   :  { %475 = vmatpush3.bf16.msra.mxu0 %v524_v1  ;;  %v532_v9 = vld [vmem:[#allocation2] sm:$0xff]   ;;  %v534_v11 = vld [vmem:[#allocation7 + $0x30] sm:$0xff]   ;;  %v535_v12 = vld [vmem:[#allocation7 + $0x28] sm:$0xff]   ;;  %s605_s12 = scalar_lea.vmem %s421_s11, 256  ;;  %p610_p2 = scmp.lt.s32.totalorder %s421_s11, %s421_s11 }
  0x29   :  { %476 = vmatprep.subr.bf16.mxu0 %v636_v0  ;;  %v533_v10 = vld [vmem:[#allocation7 + $0x38] sm:$0xff]   ;;  %v536_v13 = vld [vmem:[#allocation7 + $0x20] sm:$0xff]   ;;  %v538_v15 = vld [vmem:[#allocation7 + $0x10] sm:$0xff]   ;;  %p606_p1 = scmp.ne.s32.totalorder %s421_s11, %s605_s12  ;;  %p611_p3 = scmp.lt.s32.totalorder %s605_s12, %s605_s12 }
  0x2a   :  { %495 = vmatpush3.bf16.msra.mxu1 %v533_v10  ;;  %v537_v14 = vld [vmem:[#allocation7 + $0x18] sm:$0xff]   ;;  %v539_v16 = vld [vmem:[#allocation7 + $0x8] sm:$0xff]   ;;  %v540_v17 = vld [vmem:[#allocation7] sm:$0xff]  }
  0x2b   :  { %496 = vmatprep.subr.bf16.mxu1 %v636_v0  ;;  %v433_v18 = vld [vmem:[%s723_s2] ss:$0 sm:$0xff]  ;;  %p612_p4 = por %p611_p3, %p610_p2 }
  0x2c   :  { %477 = vmatpush3.bf16.msra.mxu0 %v525_v2  ;;  %v443_v44 = vld [vmem:[%s724_s3] ss:$0 sm:$0xff] }
  0x2d   :  { %478 = vmatprep.subr.bf16.mxu0 %v636_v0  ;;  %v444_v47 = vld [vmem:[%s725_s4] ss:$0 sm:$0xff]  ;;  %p613_p5 = pnand %p612_p4, %p606_p1 }
  0x2e   :  { %497 = vmatpush3.bf16.msra.mxu1 %v534_v11  ;;  %v445_v55 = vld [vmem:[%s727_s6] ss:$0 sm:$0xff] }
  0x2f   :  { %498 = vmatprep.subr.bf16.mxu1 %v636_v0 }
  0x30   :  { %479 = vmatpush3.bf16.msra.mxu0 %v526_v3 }
  0x31   :  { %480 = vmatprep.subr.bf16.mxu0 %v636_v0 }
  0x32   :  { %499 = vmatpush3.bf16.msra.mxu1 %v535_v12 }
  0x33   :  { %500 = vmatprep.subr.bf16.mxu1 %v636_v0 }
  0x34   :  { %481 = vmatpush3.bf16.msra.mxu0 %v527_v4 }
  0x35   :  { %482 = vmatprep.subr.bf16.mxu0 %v636_v0 }
  0x36   :  { %501 = vmatpush3.bf16.msra.mxu1 %v536_v13 }
  0x37   :  { %502 = vmatprep.subr.bf16.mxu1 %v636_v0 }
  0x38   :  { %483 = vmatpush3.bf16.msra.mxu0 %v528_v5 }
  0x39   :  { %484 = vmatprep.subr.bf16.mxu0 %v636_v0 }
  0x3a   :  { %503 = vmatpush3.bf16.msra.mxu1 %v537_v14 }
  0x3b   :  { %504 = vmatprep.subr.bf16.mxu1 %v636_v0 }
  0x3c   :  { %485 = vmatpush3.bf16.msra.mxu0 %v529_v6 }
  0x3d   :  { %486 = vmatprep.subr.bf16.mxu0 %v636_v0 }
  0x3e   :  { %505 = vmatpush3.bf16.msra.mxu1 %v538_v15 }
  0x3f   :  { %506 = vmatprep.subr.bf16.mxu1 %v636_v0 }
  0x40   :  { %487 = vmatpush3.bf16.msra.mxu0 %v530_v7 }
  0x41   :  { %488 = vmatprep.subr.bf16.mxu0 %v636_v0 }
  0x42   :  { %507 = vmatpush3.bf16.msra.mxu1 %v539_v16 }
  0x43   :  { %508 = vmatprep.subr.bf16.mxu1 %v636_v0 }
  0x44   :  { %489 = vmatpush3.bf16.msra.mxu0 %v531_v8 }
  0x46   :  { %509 = vmatpush3.bf16.msra.mxu1 %v540_v17  ;;  %v454_v17 = vld [vmem:[%s728_s7] ss:$0 sm:$0xff] }
  0x47   :  { %491 = vmatmul.mubr.bf16.vlgmr.msra.gmra.mxu0 %v532_v9 }
 0x107   :  { %v193_v19 = vpop.f32.mrf.mxu0 }
 0x108   :  { %v194_v20 = vadd.f32 %v433_v18, %v193_v19 }
 0x109   :  { %v492_v21 = vpop.f32.mrf.mxu0 }
 0x10a   :  { %v209_v22 = vrot.slane %v194_v20, 4 }
 0x10b   :  { %v196_v23 = vpop.f32.mrf.mxu0 }
 0x10c   :  { %v210_v24 = vadd.f32 %v209_v22, %v194_v20  ;;  %v197_v41 = vadd.f32 %v433_v18, %v196_v23 }
 0x10d   :  { %v493_v25 = vpop.f32.mrf.mxu0 }
 0x10e   :  { %v211_v26 = vrot.slane %v210_v24, 2 }
 0x110   :  { %v212_v27 = vadd.f32 %v211_v26, %v210_v24 }
 0x112   :  { %v213_v28 = vrot.slane %v212_v27, 1 }
 0x114   :  { %v214_v29 = vadd.f32 %v213_v28, %v212_v27 }
 0x116   :  { %v215_v30 = vmul.f32 0.125, %v214_v29 }
 0x118   :  { %v216_v31 = vsub.f32 %v194_v20, %v215_v30  ;;  %v217_v42 = vsub.f32 %v197_v41, %v215_v30  ;;  %v455_v20 = vld [vmem:[%s729_s8] ss:$0 sm:$0xff] }
 0x11a   :  { %v220_v32 = vmul.f32 %v216_v31, %v216_v31 }
 0x11c   :  { %v223_v33 = vrot.slane %v220_v32, 4 }
 0x11e   :  { %v224_v34 = vadd.f32 %v223_v33, %v220_v32 }
 0x120   :  { %v225_v35 = vrot.slane %v224_v34, 2 }
 0x122   :  { %v226_v36 = vadd.f32 %v225_v35, %v224_v34 }
 0x124   :  { %v227_v37 = vrot.slane %v226_v36, 1 }
 0x126   :  { %v228_v38 = vadd.f32 %v227_v37, %v226_v36 }
 0x128   :  { %v229_v39 = vmul.f32 0.125, %v228_v38 }
 0x12a   :  { %v230_v40 = vadd.f32 1e-05, %v229_v39 }
 0x12c   :  { %541 = vrsqrt.f32 %v230_v40 }
 0x139   :  { %v542_v43 = vpop.eup %541 }
 0x13a   :  { %v232_v45 = vmul.f32 %v542_v43, %v216_v31  ;;  %v233_v46 = vmul.f32 %v542_v43, %v217_v42 }
 0x13c   :  { %v241_v48 = vmul.f32 %v443_v44, %v233_v46  ;;  %v240_v49 = vmul.f32 %v443_v44, %v232_v45 }
 0x13e   :  { %v248_v50 = vadd.f32 %v444_v47, %v240_v49  ;;  %v249_v51 = vadd.f32 %v444_v47, %v241_v48 }
 0x140   :  { %v250_v52 = vmax.f32 %v248_v50, 0.0  ;;  %v251_v53 = vmax.f32 %v249_v51, 0.0 }
 0x142   :  { %v252_v54 = vpack.c.bf16 %v251_v53, %v250_v52 }
 0x144   :  { %511 = vmatmul.mubr.bf16.vlgmr.msra.gmra.mxu1 %v252_v54 }
 0x204   :  { %v358_v56 = vpop.f32.mrf.mxu1 }
 0x205   :  { %v359_v57 = vadd.f32 %v445_v55, %v358_v56 }
 0x206   :  { %v512_v58 = vpop.f32.mrf.mxu1 }
 0x207   :  { %v370_v59 = vrot.slane %v359_v57, 4 }
 0x208   :  { %v361_v60 = vpop.f32.mrf.mxu1 }
 0x209   :  { %v371_v61 = vadd.f32 %v370_v59, %v359_v57  ;;  %v362_v14 = vadd.f32 %v445_v55, %v361_v60 }
 0x20a   :  { %v513_v62 = vpop.f32.mrf.mxu1 }
 0x20b   :  { %v372_v63 = vrot.slane %v371_v61, 2 }
 0x20d   :  { %v373_v0 = vadd.f32 %v372_v63, %v371_v61 }
 0x20f   :  { %v374_v1 = vrot.slane %v373_v0, 1 }
 0x211   :  { %v375_v2 = vadd.f32 %v374_v1, %v373_v0 }
 0x213   :  { %v376_v3 = vmul.f32 0.125, %v375_v2 }
 0x215   :  { %v377_v4 = vsub.f32 %v359_v57, %v376_v3  ;;  %v378_v15 = vsub.f32 %v362_v14, %v376_v3 }
 0x217   :  { %v381_v5 = vmul.f32 %v377_v4, %v377_v4 }
 0x219   :  { %v384_v6 = vrot.slane %v381_v5, 4 }
 0x21b   :  { %v385_v7 = vadd.f32 %v384_v6, %v381_v5 }
 0x21d   :  { %v386_v8 = vrot.slane %v385_v7, 2 }
 0x21f   :  { %v387_v9 = vadd.f32 %v386_v8, %v385_v7 }
 0x221   :  { %v388_v10 = vrot.slane %v387_v9, 1 }
 0x223   :  { %v389_v11 = vadd.f32 %v388_v10, %v387_v9 }
 0x225   :  { %v390_v12 = vmul.f32 0.125, %v389_v11 }
 0x227   :  { %v391_v13 = vadd.f32 1e-05, %v390_v12 }
 0x229   :  { %543 = vrsqrt.f32 %v391_v13 }
 0x236   :  { %v544_v16 = vpop.eup %543 }
 0x237   :  { %v393_v18 = vmul.f32 %v544_v16, %v377_v4  ;;  %v394_v19 = vmul.f32 %v544_v16, %v378_v15 }
 0x239   :  { %v401_v21 = vmul.f32 %v454_v17, %v393_v18  ;;  %v402_v22 = vmul.f32 %v454_v17, %v394_v19 }
 0x23b   :  { %v409_v23 = vadd.f32 %v455_v20, %v401_v21  ;;  %v410_v24 = vadd.f32 %v455_v20, %v402_v22 }
 0x23d   :  { %v412_v25 = vmax.f32 %v410_v24, 0.0  ;;  %v411_v26 = vmax.f32 %v409_v23, 0.0 }
 0x23f   :  { %414 = vst [vmem:[#allocation8 + $0x8] sm:$0xff] %v412_v25  ;;  %413 = vst [vmem:[#allocation8] sm:$0xff] %v411_v26 }
 0x240   :  { %616 = shalt.err (!%p613_p5)
}
 0x241   :  { %s639_s7 = smov 128   ;;  %s640_s8 = smov 8  }
 0x242   :  { %426 = dma.vmem_to_hbm [thread:$0]  %s421_s11, 256, %s730_s9, [#allocation4], %s639_s7, %s639_s7, %s640_s8  }
 0x243   :  { %629 = dma.done.wait [#allocation4], 256  }
 0x244   :  { %630 = vsyncadd [#allocation4], 4294967040 }
 0x245   :  { %430 = vsyncpa [#allocation3], 1 }
 0x246   :  { %431 = vsyncpa [#allocation6], 1 }
 0x247   :  { %432 = vsyncpa [#allocation4], 1 }

</bundles_post_ra>
